<compile_context>
chip_gen: v6e
topology: v6e:2x2x1
jax: 0.10.0
libtpu: 0.0.40
codegen_flags: <defaults>
</compile_context>

<pallas_src>
import functools

import jax
import jax.numpy as jnp
from jax.experimental import pallas as pl
from jax.experimental.pallas import tpu as pltpu

LANE = 128
SUBLANE = 8


def _round_up(n, m):
    return ((n + m - 1) // m) * m


# ---------------------------------------------------------------------------
# Kernel: one batch tile -> h = relu(x @ W1t + b1); q = h @ W2t + b2
# ---------------------------------------------------------------------------
def dqn_kernel(x_ref, w1_ref, b1_ref, w2_ref, b2_ref, o_ref):
    x = x_ref[...].astype(w1_ref.dtype)                                # (TB, S)  bf16
    h = jnp.dot(x, w1_ref[...], preferred_element_type=jnp.float32)   # (TB, Hp) f32 acc
    h = jnp.maximum(h + b1_ref[...], 0.0)                             # bias + ReLU, f32 VPU
    q = jnp.dot(h.astype(w2_ref.dtype), w2_ref[...],
                preferred_element_type=jnp.float32)                   # (TB, A)  f32 acc
    o_ref[...] = (q + b2_ref[...]).astype(o_ref.dtype)


# ---------------------------------------------------------------------------
# One-time parameter preparation (hoisted out of the hot path):
#   - transpose PyTorch (out, in) weights to (in, out) for lane-dense dots
#   - pad hidden dim H up to 128 lanes (zero pad is mathematically inert:
#     relu(0 + 0) = 0, zero W2 rows contribute 0)
#   - matmul operands in bf16; biases stay f32
# ---------------------------------------------------------------------------
def prepare_params(w1, b1, w2, b2, matmul_dtype=jnp.bfloat16):
    H, S = w1.shape
    A = w2.shape[0]
    Hp = _round_up(H, LANE)

    w1_t = jnp.zeros((S, Hp), matmul_dtype).at[:, :H].set(w1.T.astype(matmul_dtype))
    b1_p = jnp.zeros((1, Hp), jnp.float32).at[0, :H].set(b1.astype(jnp.float32))
    w2_t = jnp.zeros((Hp, A), matmul_dtype).at[:H, :].set(w2.T.astype(matmul_dtype))
    b2_p = b2.astype(jnp.float32).reshape(1, A)

    return {"w1_t": w1_t, "b1": b1_p, "w2_t": w2_t, "b2": b2_p,
            "state_size": S, "hidden": H, "action_size": A}


# ---------------------------------------------------------------------------
# Forward: batch-tiled pallas_call with VMEM-resident weights.
# ---------------------------------------------------------------------------
def dqn_forward(x, params, block_b=2048):
    w1_t, b1_p, w2_t, b2_p = params["w1_t"], params["b1"], params["w2_t"], params["b2"]
    S, H, A = params["state_size"], params["hidden"], params["action_size"]
    Hp = w1_t.shape[1]
    B = x.shape[0]

    # Latency path: single-env / tiny act-selection batches skip the
    # custom-call boundary entirely (dispatch >> math at this size).
    if B < 2 * SUBLANE:
        dt = w1_t.dtype
        h = jnp.maximum(
            jnp.dot(x.astype(dt), w1_t, preferred_element_type=jnp.float32) + b1_p, 0.0)
        return jnp.dot(h.astype(dt), w2_t, preferred_element_type=jnp.float32) + b2_p

    # Batch tiling: one step per block_b rows, but at least 2 steps so the
    # "parallel" batch axis can shard across both TensorCores on v7x.
    steps = pl.cdiv(B, block_b)
    if steps == 1:
        steps = 2
    TB = _round_up(pl.cdiv(B, steps), SUBLANE)
    grid = (pl.cdiv(B, TB),)          # ragged last tile handled by Pallas masking

    flops = 2 * B * (S * H + H * A)
    bytes_accessed = (x.dtype.itemsize * B * S
                      + w1_t.dtype.itemsize * (S * Hp + Hp * A)
                      + 4 * (Hp + A)
                      + 4 * B * A)

    return pl.pallas_call(
        dqn_kernel,
        out_shape=jax.ShapeDtypeStruct((B, A), jnp.float32),
        grid=grid,
        in_specs=[
            pl.BlockSpec((TB, S), lambda i: (i, 0)),    # x: tiled over batch
            pl.BlockSpec((S, Hp), lambda i: (0, 0)),    # W1^T: VMEM-resident
            pl.BlockSpec((1, Hp), lambda i: (0, 0)),    # b1
            pl.BlockSpec((Hp, A), lambda i: (0, 0)),    # W2^T: VMEM-resident
            pl.BlockSpec((1, A), lambda i: (0, 0)),     # b2
        ],
        out_specs=pl.BlockSpec((TB, A), lambda i: (i, 0)),  # unpadded (B, A) output
        compiler_params=pltpu.CompilerParams(
            dimension_semantics=("parallel",),   # v7x: batch steps across both TCs
        ),
        cost_estimate=pl.CostEstimate(
            flops=flops, transcendentals=0, bytes_accessed=bytes_accessed),
    )(x, w1_t, b1_p, w2_t, b2_p)


# Reference with matching matmul precision (bf16 operands, f32 accumulation).
def reference_forward(x, w1, b1, w2, b2, matmul_dtype=jnp.bfloat16):
    h = jnp.dot(x.astype(matmul_dtype), w1.T.astype(matmul_dtype),
                preferred_element_type=jnp.float32) + b1
    h = jnp.maximum(h, 0.0)
    return jnp.dot(h.astype(matmul_dtype), w2.T.astype(matmul_dtype),
                   preferred_element_type=jnp.float32) + b2


if __name__ == "__main__":
    # DQN on a vector-observation env (CartPole-like): state_size=4,
    # action_size=2, hidden=50 (from the module).
    S, H, A = 4, 50, 2
    B_train, B_ragged, B_act = 256, 100, 6   # 2 even tiles / ragged last tile / fast path

    key = jax.random.PRNGKey(0)
    k_x1, k_x2, k_x3, k_w1, k_b1, k_w2, k_b2 = jax.random.split(key, 7)

    x_train = jax.random.normal(k_x1, (B_train, S), dtype=jnp.float32)
    x_ragged = jax.random.normal(k_x2, (B_ragged, S), dtype=jnp.float32)
    x_act = jax.random.normal(k_x3, (B_act, S), dtype=jnp.float32)

    # Init matching the module: weights ~ N(0, 0.1); biases keep nn.Linear
    # default U(-1/sqrt(fan_in), 1/sqrt(fan_in)).
    w1 = 0.1 * jax.random.normal(k_w1, (H, S), dtype=jnp.float32)
    b1 = jax.random.uniform(k_b1, (H,), jnp.float32,
                            -1.0 / jnp.sqrt(S), 1.0 / jnp.sqrt(S))
    w2 = 0.1 * jax.random.normal(k_w2, (A, H), dtype=jnp.float32)
    b2 = jax.random.uniform(k_b2, (A,), jnp.float32,
                            -1.0 / jnp.sqrt(H), 1.0 / jnp.sqrt(H))

    # One-time prep, then a jitted forward whose only per-call work is the
    # pallas_call (no pad, no slice).
    params = prepare_params(w1, b1, w2, b2)
    fwd = jax.jit(functools.partial(dqn_forward, params=params))

    out_train = jax.block_until_ready(fwd(x_train))
    out_ragged = jax.block_until_ready(fwd(x_ragged))
    out_act = jax.block_until_ready(fwd(x_act))

    ref_train = jax.block_until_ready(reference_forward(x_train, w1, b1, w2, b2))
    ref_ragged = jax.block_until_ready(reference_forward(x_ragged, w1, b1, w2, b2))
    ref_act = jax.block_until_ready(reference_forward(x_act, w1, b1, w2, b2))

    assert out_train.shape == (B_train, A), out_train.shape
    assert out_ragged.shape == (B_ragged, A), out_ragged.shape
    assert out_act.shape == (B_act, A), out_act.shape
    assert out_train.dtype == jnp.float32
    assert jnp.allclose(out_train, ref_train, atol=1e-4, rtol=1e-4), "mismatch (train batch)"
    assert jnp.allclose(out_ragged, ref_ragged, atol=1e-4, rtol=1e-4), "mismatch (ragged batch)"
    assert jnp.allclose(out_act, ref_act, atol=1e-4, rtol=1e-4), "mismatch (act batch)"
    print("KERNEL_OK")
</pallas_src>

<mosaic_0001>
module attributes {stable_mosaic.version = 11 : i64} {
  func.func @dqn_kernel(%arg0: i32, %arg1: memref<128x4xf32, #tpu.memory_space<vmem>>, %arg2: memref<4x128xbf16, #tpu.memory_space<vmem>>, %arg3: memref<1x128xf32, #tpu.memory_space<vmem>>, %arg4: memref<128x2xbf16, #tpu.memory_space<vmem>>, %arg5: memref<1x2xf32, #tpu.memory_space<vmem>>, %arg6: memref<128x2xf32, #tpu.memory_space<vmem>>) attributes {dimension_semantics = [#tpu.dimension_semantics<parallel>], iteration_bounds = array<i64: 2>, scalar_prefetch = 0 : i64, scratch_operands = 0 : i64, tpu.core_type = #tpu.core_type<tc>, window_params = [{transform_indices = @transform_0, window_bounds = array<i64: 128, 4>}, {pipeline_mode = #tpu.pipeline_mode<synchronous>, transform_indices = @transform_1, window_bounds = array<i64: 4, 128>}, {pipeline_mode = #tpu.pipeline_mode<synchronous>, transform_indices = @transform_2, window_bounds = array<i64: 1, 128>}, {pipeline_mode = #tpu.pipeline_mode<synchronous>, transform_indices = @transform_3, window_bounds = array<i64: 128, 2>}, {pipeline_mode = #tpu.pipeline_mode<synchronous>, transform_indices = @transform_4, window_bounds = array<i64: 1, 2>}, {transform_indices = @transform_5, window_bounds = array<i64: 128, 2>}]} {
    %c0 = arith.constant 0 : index
    %c0_0 = arith.constant 0 : index
    %0 = vector.load %arg1[%c0, %c0_0] : memref<128x4xf32, #tpu.memory_space<vmem>>, vector<128x4xf32>
    %1 = arith.truncf %0 : vector<128x4xf32> to vector<128x4xbf16>
    %c0_1 = arith.constant 0 : index
    %c0_2 = arith.constant 0 : index
    %2 = vector.load %arg2[%c0_1, %c0_2] : memref<4x128xbf16, #tpu.memory_space<vmem>>, vector<4x128xbf16>
    %cst = arith.constant dense<0.000000e+00> : vector<128x128xf32>
    %3 = tpu.matmul %1, %2, %cst {dimension_numbers = #tpu.dot_dimension_numbers<[1], [0], [0], [1], [0, 0, 1, 1], [], []>} : vector<128x4xbf16>, vector<4x128xbf16>, vector<128x128xf32> -> vector<128x128xf32>
    %c0_3 = arith.constant 0 : index
    %c0_4 = arith.constant 0 : index
    %4 = vector.load %arg3[%c0_3, %c0_4] : memref<1x128xf32, #tpu.memory_space<vmem>>, vector<1x128xf32>
    %5 = vector.broadcast %4 : vector<1x128xf32> to vector<128x128xf32>
    %6 = arith.addf %3, %5 : vector<128x128xf32>
    %cst_5 = arith.constant 0.000000e+00 : f32
    %7 = vector.broadcast %cst_5 : f32 to vector<128x128xf32>
    %8 = arith.maximumf %6, %7 : vector<128x128xf32>
    %9 = arith.truncf %8 : vector<128x128xf32> to vector<128x128xbf16>
    %c0_6 = arith.constant 0 : index
    %c0_7 = arith.constant 0 : index
    %10 = vector.load %arg4[%c0_6, %c0_7] : memref<128x2xbf16, #tpu.memory_space<vmem>>, vector<128x2xbf16>
    %cst_8 = arith.constant dense<0.000000e+00> : vector<128x2xf32>
    %11 = tpu.matmul %9, %10, %cst_8 {dimension_numbers = #tpu.dot_dimension_numbers<[1], [0], [0], [1], [0, 0, 1, 1], [], []>} : vector<128x128xbf16>, vector<128x2xbf16>, vector<128x2xf32> -> vector<128x2xf32>
    %c0_9 = arith.constant 0 : index
    %c0_10 = arith.constant 0 : index
    %12 = vector.load %arg5[%c0_9, %c0_10] : memref<1x2xf32, #tpu.memory_space<vmem>>, vector<1x2xf32>
    %13 = vector.broadcast %12 : vector<1x2xf32> to vector<128x2xf32>
    %14 = arith.addf %11, %13 : vector<128x2xf32>
    %c0_11 = arith.constant 0 : index
    %c0_12 = arith.constant 0 : index
    %15 = vector.load %arg6[%c0_11, %c0_12] : memref<128x2xf32, #tpu.memory_space<vmem>>, vector<128x2xf32>
    tpu.vector_store %arg6[%c0_11, %c0_12], %14 {strides = array<i32>} : memref<128x2xf32, #tpu.memory_space<vmem>>, vector<128x2xf32>,
    return
  }
  func.func @transform_0(%arg0: i32) -> (i32, i32) {
    %c0_i32 = arith.constant 0 : i32
    %c0_i32_0 = arith.constant 0 : i32
    return %arg0, %c0_i32 : i32, i32
  }
  func.func @transform_1(%arg0: i32) -> (i32, i32) {
    %c0_i32 = arith.constant 0 : i32
    %c0_i32_0 = arith.constant 0 : i32
    %c0_i32_1 = arith.constant 0 : i32
    return %c0_i32, %c0_i32_0 : i32, i32
  }
  func.func @transform_2(%arg0: i32) -> (i32, i32) {
    %c0_i32 = arith.constant 0 : i32
    %c0_i32_0 = arith.constant 0 : i32
    %c0_i32_1 = arith.constant 0 : i32
    return %c0_i32, %c0_i32_0 : i32, i32
  }
  func.func @transform_3(%arg0: i32) -> (i32, i32) {
    %c0_i32 = arith.constant 0 : i32
    %c0_i32_0 = arith.constant 0 : i32
    %c0_i32_1 = arith.constant 0 : i32
    return %c0_i32, %c0_i32_0 : i32, i32
  }
  func.func @transform_4(%arg0: i32) -> (i32, i32) {
    %c0_i32 = arith.constant 0 : i32
    %c0_i32_0 = arith.constant 0 : i32
    %c0_i32_1 = arith.constant 0 : i32
    return %c0_i32, %c0_i32_0 : i32, i32
  }
  func.func @transform_5(%arg0: i32) -> (i32, i32) {
    %c0_i32 = arith.constant 0 : i32
    %c0_i32_0 = arith.constant 0 : i32
    return %arg0, %c0_i32 : i32, i32
  }
}

</mosaic_0001>

<bundles_post_ra>
// kernel: dqn_forward.1
= control target key start
LH: loop header
LB: loop body
LE: loop exit
PB: predicated region body
PF: predicated region fallthrough
CT: control target
= control target key end

     0   :  { %s827_s18 = smov 0   ;;  %s944_s0 = inlined_call_operand.vmem [shape: f32[256,4], index: 0, kind: input, shape index: {}]   ;;  %s945_s1 = inlined_call_operand.vmem [shape: bf16[4,128], index: 1, kind: input, shape index: {}]   ;;  %s946_s2 = inlined_call_operand.vmem [shape: f32[1,128], index: 2, kind: input, shape index: {}]   ;;  %s947_s3 = inlined_call_operand.vmem [shape: bf16[128,2], index: 3, kind: input, shape index: {}]   ;;  %s948_s4 = inlined_call_operand.vmem [shape: f32[1,2], index: 4, kind: input, shape index: {}]   ;;  %s949_s5 = inlined_call_operand.vmem [shape: f32[256,2], index: 5, kind: output, shape index: {}]  }
   0x1 LB: > { %s652_s19 = sadd.s32 4294967295, %s795_s18   ;;  %p656_p0 = scmp.ge.s32.totalorder %s795_s18, 1  ;;  %s795_s18 = sphi %s827_s18, %s15_s18  }
   0x2   : > { %p188_p1 = scmp.lt.s32.totalorder %s795_s18, 3 }
   0x4   : > { %p189_p2 = pnand %p656_p0, %p188_p1 }
   0x5   : > { %s657_s22 = sshll.u32 (!%p189_p2), %s652_s19, 4 }
   0x6   : > { %192 = sbr.rel (%p189_p2) target bundleno = 450 (0x1c2), region = 40  ;;  %p217_p3 = scmp.lt.s32.totalorder (!%p189_p2), %s657_s22, 31 }
   0xb   : > { %v253_v0 = vld [vmem:[%s945_s1] sm:$0x3]  ;;  %vm286_vm0 = vcmask 1041408   ;;  %v781_v1 = vld [vmem:[%s947_s3 + $0x38] sm:$0xff]   ;;  %v782_v3 = vld [vmem:[%s947_s3 + $0x30] sm:$0xff]   ;;  %s951_s22 = smov (!%p217_p3, %s657_s22), 31 }
   0xc   : > { %772 = vmatprep.subr.msk.bf16.mxu0 %vm286_vm0, %v253_v0  ;;  %v288_v2 = vsel %vm286_vm0, %v253_v0, 0  ;;  %756 = vmatprep.subr.bf16.mxu1 %v781_v1  ;;  %s658_s27 = sshll.u32 %s951_s22, 3  ;;  %v783_v4 = vld [vmem:[%s947_s3 + $0x28] sm:$0xff]   ;;  %vm261_vm1 = vcmask 31744   ;;  %v784_v15 = vld [vmem:[%s947_s3 + $0x20] sm:$0xff]   ;;  %v785_v19 = vld [vmem:[%s947_s3 + $0x18] sm:$0xff]  }
   0xd   : > { %707 = vmatpush3.bf16.msra.mxu0 %v288_v2  ;;  %764 = vmatpush3.bf16.msra.mxu1 %v781_v1  ;;  %s855_s7 = scalar_lea.vmem %s944_s0, %s658_s27  ;;  %v786_v31 = vld [vmem:[%s947_s3 + $0x10] sm:$0xff]   ;;  %v787_v32 = vld [vmem:[%s947_s3 + $0x8] sm:$0xff]   ;;  %v788_v33 = vld [vmem:[%s947_s3] sm:$0xff]   ;;  %s907_s26 = scalar_lea.vmem %s949_s5, %s658_s27  ;;  %vm579_vm2 = vcmask 15360  }
   0xe   : > { %724 = vmatprep.subr.bf16.mxu0 %v781_v1  ;;  %757 = vmatprep.subr.bf16.mxu1 %v782_v3  ;;  %v229_v5 = vld [vmem:[%s855_s7] sm:$0xff]  ;;  %v230_v6 = vld [vmem:[%s855_s7 + $0x8] sm:$0xff]  ;;  %v231_v7 = vld [vmem:[%s855_s7 + $0x10] sm:$0xff] }
   0xf   : > { %v245_v8 = vpack.c.bf16 %v230_v6, %v229_v5  ;;  %v232_v9 = vld [vmem:[%s855_s7 + $0x18] sm:$0xff]  ;;  %v233_v10 = vld [vmem:[%s855_s7 + $0x20] sm:$0xff]  ;;  %v234_v11 = vld [vmem:[%s855_s7 + $0x28] sm:$0xff] }
  0x10   : > { %v246_v12 = vpack.c.bf16 %v232_v9, %v231_v7  ;;  %v247_v13 = vpack.c.bf16 %v234_v11, %v233_v10  ;;  %v235_v14 = vld [vmem:[%s855_s7 + $0x30] sm:$0xff]  ;;  %v236_v16 = vld [vmem:[%s855_s7 + $0x38] sm:$0xff]  ;;  %v237_v17 = vld [vmem:[%s855_s7 + $0x40] sm:$0xff] }
  0x11   : > { %765 = vmatpush3.bf16.msra.mxu1 %v782_v3  ;;  %708 = vmatprep.mubr.msk.bf16.mxu0 %vm261_vm1, %v245_v8  ;;  %v238_v18 = vld [vmem:[%s855_s7 + $0x48] sm:$0xff]  ;;  %v248_v20 = vpack.c.bf16 %v236_v16, %v235_v14  ;;  %v239_v22 = vld [vmem:[%s855_s7 + $0x50] sm:$0xff]  ;;  %v240_v23 = vld [vmem:[%s855_s7 + $0x58] sm:$0xff] }
  0x12   : > { %758 = vmatprep.subr.bf16.mxu1 %v783_v4  ;;  %709 = vmatmul.mubr.msk.bf16.vlgmr.msra.gmra.mxu0 %vm261_vm1, %v246_v12  ;;  %v249_v21 = vpack.c.bf16 %v238_v18, %v237_v17  ;;  %v241_v24 = vld [vmem:[%s855_s7 + $0x60] sm:$0xff]  ;;  %v242_v25 = vld [vmem:[%s855_s7 + $0x68] sm:$0xff]  ;;  %v250_v26 = vpack.c.bf16 %v240_v23, %v239_v22  ;;  %v243_v28 = vld [vmem:[%s855_s7 + $0x70] sm:$0xff] }
  0x13   : > { %712 = vmatprep.mubr.msk.bf16.mxu0 %vm261_vm1, %v247_v13  ;;  %725 = vmatpush3.bf16.msra.mxu0 %v781_v1  ;;  %v251_v27 = vpack.c.bf16 %v242_v25, %v241_v24  ;;  %v244_v29 = vld [vmem:[%s855_s7 + $0x78] sm:$0xff]  ;;  %v661_v36 = vld [vmem:[%s946_s2] ss:$0 sm:$0xff] }
  0x14   : > { %726 = vmatprep.subr.bf16.mxu0 %v782_v3  ;;  %v252_v30 = vpack.c.bf16 %v244_v29, %v243_v28 }
  0x15   : > { %766 = vmatpush3.bf16.msra.mxu1 %v783_v4 }
  0x16   : > { %759 = vmatprep.subr.bf16.mxu1 %v784_v15 }
  0x17   : > { %727 = vmatpush3.bf16.msra.mxu0 %v782_v3 }
  0x18   : > { %728 = vmatprep.subr.bf16.mxu0 %v783_v4 }
  0x19   : > { %767 = vmatpush3.bf16.msra.mxu1 %v784_v15 }
  0x1a   : > { %760 = vmatprep.subr.bf16.mxu1 %v785_v19  ;;  %713 = vmatmul.mubr.msk.bf16.gmra.mxu0 %vm261_vm1, %v248_v20 }
  0x1b   : > { %716 = vmatprep.mubr.msk.bf16.mxu0 %vm261_vm1, %v249_v21  ;;  %729 = vmatpush3.bf16.msra.mxu0 %v783_v4 }
  0x1c   : > { %730 = vmatprep.subr.bf16.mxu0 %v784_v15 }
  0x1d   : > { %768 = vmatpush3.bf16.msra.mxu1 %v785_v19 }
  0x1e   : > { %761 = vmatprep.subr.bf16.mxu1 %v786_v31 }
  0x1f   : > { %731 = vmatpush3.bf16.msra.mxu0 %v784_v15 }
  0x20   : > { %732 = vmatprep.subr.bf16.mxu0 %v785_v19 }
  0x21   : > { %769 = vmatpush3.bf16.msra.mxu1 %v786_v31 }
  0x22   : > { %717 = vmatmul.mubr.msk.bf16.gmra.mxu0 %vm261_vm1, %v250_v26  ;;  %762 = vmatprep.subr.bf16.mxu1 %v787_v32 }
  0x23   : > { %720 = vmatprep.mubr.msk.bf16.mxu0 %vm261_vm1, %v251_v27  ;;  %733 = vmatpush3.bf16.msra.mxu0 %v785_v19  ;;  %v670_v27 = vld [vmem:[%s948_s4] ss:$0 sm:$0xff] }
  0x24   : > { %734 = vmatprep.subr.bf16.mxu0 %v786_v31 }
  0x25   : > { %770 = vmatpush3.bf16.msra.mxu1 %v787_v32 }
  0x26   : > { %763 = vmatprep.subr.bf16.mxu1 %v788_v33 }
  0x27   : > { %735 = vmatpush3.bf16.msra.mxu0 %v786_v31 }
  0x28   : > { %736 = vmatprep.subr.bf16.mxu0 %v787_v32 }
  0x29   : > { %771 = vmatpush3.bf16.msra.mxu1 %v788_v33 }
  0x2a   : > { %721 = vmatmul.mubr.msk.bf16.gmra.mxu0 %vm261_vm1, %v252_v30 }
  0x2b   : > { %737 = vmatpush3.bf16.msra.mxu0 %v787_v32 }
  0x2c   : > { %738 = vmatprep.subr.bf16.mxu0 %v788_v33 }
  0x2f   : > { %739 = vmatpush3.bf16.msra.mxu0 %v788_v33 }
  0xd2   : > { %v710_v34 = vpop.f32.mrf.mxu0 }
  0xd3   : > { %v333_v40 = vadd.f32 %v710_v34, %v661_v36 }
  0xd4   : > { %v324_v35 = vpop.f32.mrf.mxu0 }
  0xd5   : > { %v325_v38 = vadd.f32 %v661_v36, %v324_v35  ;;  %v389_v47 = vmax.f32 %v333_v40, 0.0 }
  0xd6   : > { %v711_v37 = vpop.f32.mrf.mxu0 }
  0xd7   : > { %v336_v39 = vadd.f32 %v711_v37, %v661_v36  ;;  %v387_v45 = vmax.f32 %v325_v38, 0.0 }
  0xd8   : > { %v327_v41 = vpop.f32.mrf.mxu0 }
  0xd9   : > { %v328_v42 = vadd.f32 %v661_v36, %v327_v41  ;;  %v390_v43 = vmax.f32 %v336_v39, 0.0 }
  0xda   : > { %v714_v44 = vpop.f32.mrf.mxu0 }
  0xdb   : > { %v388_v46 = vmax.f32 %v328_v42, 0.0  ;;  %v404_v50 = vpack.c.bf16 %v390_v43, %v389_v47  ;;  %v349_v54 = vadd.f32 %v714_v44, %v661_v36 }
  0xdc   : > { %v340_v48 = vpop.f32.mrf.mxu0 }
  0xdd   : > { %v403_v49 = vpack.c.bf16 %v388_v46, %v387_v45  ;;  %v341_v52 = vadd.f32 %v661_v36, %v340_v48  ;;  %v393_v61 = vmax.f32 %v349_v54, 0.0 }
  0xde   : > { %v715_v51 = vpop.f32.mrf.mxu0 }
  0xdf   : > { %v352_v53 = vadd.f32 %v715_v51, %v661_v36  ;;  %740 = vmatprep.mubr.bf16.mxu0 %v403_v49  ;;  %v391_v59 = vmax.f32 %v341_v52, 0.0 }
  0xe0   : > { %v343_v55 = vpop.f32.mrf.mxu0  ;;  %741 = vmatmul.mubr.bf16.vlgmr.msra.gmra.mxu0 %v404_v50 }
  0xe1   : > { %v344_v56 = vadd.f32 %v661_v36, %v343_v55  ;;  %v394_v57 = vmax.f32 %v352_v53, 0.0 }
  0xe2   : > { %v718_v58 = vpop.f32.mrf.mxu0 }
  0xe3   : > { %v392_v60 = vmax.f32 %v344_v56, 0.0  ;;  %v406_v0 = vpack.c.bf16 %v394_v57, %v393_v61  ;;  %v365_v4 = vadd.f32 %v718_v58, %v661_v36 }
  0xe4   : > { %v356_v62 = vpop.f32.mrf.mxu0 }
  0xe5   : > { %v405_v63 = vpack.c.bf16 %v392_v60, %v391_v59  ;;  %v357_v2 = vadd.f32 %v661_v36, %v356_v62  ;;  %v397_v11 = vmax.f32 %v365_v4, 0.0 }
  0xe6   : > { %v719_v1 = vpop.f32.mrf.mxu0 }
  0xe7   : > { %v368_v3 = vadd.f32 %v719_v1, %v661_v36  ;;  %744 = vmatprep.mubr.bf16.mxu1 %v405_v63  ;;  %v395_v9 = vmax.f32 %v357_v2, 0.0 }
  0xe8   : > { %v359_v5 = vpop.f32.mrf.mxu0  ;;  %745 = vmatmul.mubr.bf16.vlgmr.msra.gmra.mxu1 %v406_v0 }
  0xe9   : > { %v360_v6 = vadd.f32 %v661_v36, %v359_v5  ;;  %v398_v7 = vmax.f32 %v368_v3, 0.0 }
  0xea   : > { %v722_v8 = vpop.f32.mrf.mxu0 }
  0xeb   : > { %v396_v10 = vmax.f32 %v360_v6, 0.0  ;;  %v408_v14 = vpack.c.bf16 %v398_v7, %v397_v11  ;;  %v381_v18 = vadd.f32 %v722_v8, %v661_v36 }
  0xec   : > { %v372_v12 = vpop.f32.mrf.mxu0 }
  0xed   : > { %v407_v13 = vpack.c.bf16 %v396_v10, %v395_v9  ;;  %v373_v16 = vadd.f32 %v661_v36, %v372_v12  ;;  %v401_v24 = vmax.f32 %v381_v18, 0.0 }
  0xee   : > { %v723_v15 = vpop.f32.mrf.mxu0 }
  0xef   : > { %v384_v17 = vadd.f32 %v723_v15, %v661_v36  ;;  %748 = vmatprep.mubr.bf16.mxu1 %v407_v13  ;;  %v399_v22 = vmax.f32 %v373_v16, 0.0 }
  0xf0   : > { %v375_v19 = vpop.f32.mrf.mxu0  ;;  %749 = vmatmul.mubr.bf16.gmra.mxu1 %v408_v14 }
  0xf1   : > { %v376_v20 = vadd.f32 %v661_v36, %v375_v19  ;;  %v402_v21 = vmax.f32 %v384_v17, 0.0 }
  0xf3   : > { %v400_v23 = vmax.f32 %v376_v20, 0.0  ;;  %v410_v26 = vpack.c.bf16 %v402_v21, %v401_v24 }
  0xf5   : > { %v409_v25 = vpack.c.bf16 %v400_v23, %v399_v22 }
  0xf7   : > { %752 = vmatprep.mubr.bf16.mxu1 %v409_v25 }
  0xf8   : > { %753 = vmatmul.mubr.bf16.gmra.mxu1 %v410_v26 }
 0x1a0   : > { %v742_v28 = vpop.f32.mrf.mxu0 }
 0x1a1   : > { %v525_v29 = vadd.f32 %v742_v28, %v670_v27 }
 0x1a2   : > { %v516_v30 = vpop.f32.mrf.mxu0 }
 0x1a3   : > { %582 = vst.msk [vmem:[%s907_s26 + $0x10] sm:$0xff] %vm579_vm2, %v525_v29  ;;  %v517_v31 = vadd.f32 %v670_v27, %v516_v30 }
 0x1a4   : > { %v743_v32 = vpop.f32.mrf.mxu0 }
 0x1a5   : > { %580 = vst.msk [vmem:[%s907_s26] sm:$0xff] %vm579_vm2, %v517_v31  ;;  %v528_v33 = vadd.f32 %v743_v32, %v670_v27 }
 0x1a6   : > { %v519_v34 = vpop.f32.mrf.mxu0 }
 0x1a7   : > { %583 = vst.msk [vmem:[%s907_s26 + $0x18] sm:$0xff] %vm579_vm2, %v528_v33  ;;  %v520_v35 = vadd.f32 %v670_v27, %v519_v34 }
 0x1a8   : > { %v746_v36 = vpop.f32.mrf.mxu1 }
 0x1a9   : > { %581 = vst.msk [vmem:[%s907_s26 + $0x8] sm:$0xff] %vm579_vm2, %v520_v35  ;;  %v541_v37 = vadd.f32 %v746_v36, %v670_v27 }
 0x1aa   : > { %v532_v38 = vpop.f32.mrf.mxu1 }
 0x1ab   : > { %586 = vst.msk [vmem:[%s907_s26 + $0x30] sm:$0xff] %vm579_vm2, %v541_v37  ;;  %v533_v39 = vadd.f32 %v670_v27, %v532_v38 }
 0x1ac   : > { %v747_v40 = vpop.f32.mrf.mxu1 }
 0x1ad   : > { %584 = vst.msk [vmem:[%s907_s26 + $0x20] sm:$0xff] %vm579_vm2, %v533_v39  ;;  %v544_v41 = vadd.f32 %v747_v40, %v670_v27 }
 0x1ae   : > { %v535_v42 = vpop.f32.mrf.mxu1 }
 0x1af   : > { %587 = vst.msk [vmem:[%s907_s26 + $0x38] sm:$0xff] %vm579_vm2, %v544_v41  ;;  %v536_v43 = vadd.f32 %v670_v27, %v535_v42 }
 0x1b0   : > { %v750_v44 = vpop.f32.mrf.mxu1 }
 0x1b1   : > { %585 = vst.msk [vmem:[%s907_s26 + $0x28] sm:$0xff] %vm579_vm2, %v536_v43  ;;  %v557_v45 = vadd.f32 %v750_v44, %v670_v27 }
 0x1b2   : > { %v548_v46 = vpop.f32.mrf.mxu1 }
 0x1b3   : > { %590 = vst.msk [vmem:[%s907_s26 + $0x50] sm:$0xff] %vm579_vm2, %v557_v45  ;;  %v549_v47 = vadd.f32 %v670_v27, %v548_v46 }
 0x1b4   : > { %v751_v48 = vpop.f32.mrf.mxu1 }
 0x1b5   : > { %588 = vst.msk [vmem:[%s907_s26 + $0x40] sm:$0xff] %vm579_vm2, %v549_v47  ;;  %v560_v49 = vadd.f32 %v751_v48, %v670_v27 }
 0x1b6   : > { %v551_v50 = vpop.f32.mrf.mxu1 }
 0x1b7   : > { %591 = vst.msk [vmem:[%s907_s26 + $0x58] sm:$0xff] %vm579_vm2, %v560_v49  ;;  %v552_v51 = vadd.f32 %v670_v27, %v551_v50 }
 0x1b8   : > { %v754_v52 = vpop.f32.mrf.mxu1 }
 0x1b9   : > { %589 = vst.msk [vmem:[%s907_s26 + $0x48] sm:$0xff] %vm579_vm2, %v552_v51  ;;  %v573_v53 = vadd.f32 %v754_v52, %v670_v27 }
 0x1ba   : > { %v564_v54 = vpop.f32.mrf.mxu1 }
 0x1bb   : > { %594 = vst.msk [vmem:[%s907_s26 + $0x70] sm:$0xff] %vm579_vm2, %v573_v53  ;;  %v565_v55 = vadd.f32 %v670_v27, %v564_v54 }
 0x1bc   : > { %v755_v56 = vpop.f32.mrf.mxu1 }
 0x1bd   : > { %592 = vst.msk [vmem:[%s907_s26 + $0x60] sm:$0xff] %vm579_vm2, %v565_v55  ;;  %v576_v57 = vadd.f32 %v755_v56, %v670_v27 }
 0x1be   : > { %v567_v58 = vpop.f32.mrf.mxu1 }
 0x1bf   : > { %595 = vst.msk [vmem:[%s907_s26 + $0x78] sm:$0xff] %vm579_vm2, %v576_v57  ;;  %v568_v59 = vadd.f32 %v670_v27, %v567_v58 }
 0x1c1   : > { %593 = vst.msk [vmem:[%s907_s26 + $0x68] sm:$0xff] %vm579_vm2, %v568_v59 }
 0x1c2 PF: > { %s15_s18 = sadd.s32 1, %s795_s18  }
 0x1c3   : > { %p12_p4 = scmp.ge.s32.totalorder %s15_s18, 4  }
 0x1c5   :  { %14 = sbr.rel (!%p12_p4) target bundleno = 1 (0x1), region = 70 }

</bundles_post_ra>
